<compile_context>
chip_gen: v7x
topology: tpu7x:2x2x1
jax: 0.10.0
libtpu: 0.0.40
codegen_flags: <defaults>
</compile_context>

<pallas_src>
import functools

import jax
import jax.numpy as jnp
from jax.experimental import pallas as pl
from jax.experimental.pallas import tpu as pltpu

# ---- model hyper-parameters (consistent with the PyTorch module) ------------
N_EMBED = 32                         # embedding dim C
BLOCK_SIZE = 8                       # max sequence length T
NUM_HEADS = 4
HEAD_SIZE = N_EMBED // NUM_HEADS     # 8
DROPOUT = 0.1                        # unused at eval time (identity)

# Finite "minus infinity" for masking. NOTE: safe here because the causal mask
# never masks an entire row (the diagonal is always kept); a mask that can zero
# out a full row would need extra handling.
NEG_INF = -1e30


# -----------------------------------------------------------------------------
# Fused kernel: ONE invocation for the whole batch.
#   qkv  = x @ Wqkv                                     (16,32) x (32,96)
#   per (batch, head): wei = softmax(mask(q k^T * C^-0.5)) ; oh = wei @ v
#     -> expressed as two batched dot_generals on head-block-masked operands
#   y    = concat(heads) @ Wproj + bproj                (16,32) x (32,32)
# -----------------------------------------------------------------------------
def _mha_fused_kernel(x_ref, wqkv_ref, wproj_ref, bproj_ref,
                      head_mask_ref, causal_bias_ref, o_ref,
                      *, batch, seq, num_heads):
    B, T, H = batch, seq, num_heads
    BT, C = x_ref.shape                 # (B*T, C) = (16, 32)
    J = H * T                           # packed (head, src-pos) axis = 32

    # NOTE: the PyTorch module scales by C**-0.5 (embedding dim), not
    # head_size**-0.5 -- we match the module exactly.
    scale = C ** (-0.5)

    x2 = x_ref[...]                                         # (BT, C)

    # Single QKV projection for ALL heads and the whole batch.
    qkv = jnp.dot(x2, wqkv_ref[...],
                  preferred_element_type=jnp.float32)       # (BT, 3C)
    q = qkv[:, 0 * C:1 * C]                                 # head h -> cols h*HS:(h+1)*HS
    k = qkv[:, 1 * C:2 * C]
    v = qkv[:, 2 * C:3 * C]

    # Leading-dim-only reshapes (free: tile layout unchanged).
    q3 = q.reshape(B, T, C)
    k3 = k.reshape(B, T, C)
    v3 = v.reshape(B, T, C)

    # head_mask[j, c] = 1.0 iff (j // T) == (c // HS): block-diagonal selector.
    head_mask = head_mask_ref[...]                          # (J, C)
    # causal_bias[t, j] = 0 if (j % T) <= t else NEG_INF
    causal_bias = causal_bias_ref[...]                      # (T, J)

    # Replicate k/v along the sublane axis (H copies) and mask each copy to its
    # own head's columns -> block-structured operands. All VPU work, no lane
    # shuffles, no per-head slicing.
    k_rep = jnp.concatenate([k3] * H, axis=1)               # (B, J, C)
    v_rep = jnp.concatenate([v3] * H, axis=1)               # (B, J, C)
    k_bd = k_rep * head_mask[None]                          # zero out other heads
    v_bd = v_rep * head_mask[None]

    # Scores for ALL heads at once: s[b, t, h*T + s] = q_h[t] . k_h[s].
    # Single-leading-batch-dim dot_general (the 'bqd,bkd->bqk' pattern).
    s = jnp.einsum('btc,bjc->btj', q3, k_bd,
                   preferred_element_type=jnp.float32) * scale   # (B, T, J)
    s = s + causal_bias[None]                                     # causal mask

    # Numerically-stable softmax per (row, head-block). Using the global row
    # max (over all heads) is valid: it only rescales numerator & denominator
    # identically within each head block.
    m = jnp.max(s, axis=-1, keepdims=True)                  # (B, T, 1)
    e = jnp.exp(s - m)                                      # masked entries -> 0.0

    # Per-head softmax denominators, broadcast to every output column of that
    # head, via one matmul with the block mask (MXU is idle anyway).
    denom = jnp.dot(e.reshape(BT, J), head_mask,
                    preferred_element_type=jnp.float32)     # (BT, C), > 0 always

    # Unnormalized attention output, already concatenated over heads on lanes:
    # out[b, t, h*HS + d] = sum_s e[b, t, h*T + s] * v[b, s, h*HS + d]
    att_un = jnp.einsum('btj,bjc->btc', e, v_bd,
                        preferred_element_type=jnp.float32)  # (B, T, C)

    att = att_un.reshape(BT, C) / denom                      # exact divide

    # Output projection + bias; one lane-dense (BT, C) store.
    y = jnp.dot(att, wproj_ref[...],
                preferred_element_type=jnp.float32) + bproj_ref[...]
    # TODO(synk): dropout on attention weights / projection output is a no-op
    # in eval mode; training-mode dropout would need pltpu PRNG + masking.
    o_ref[...] = y.astype(o_ref.dtype)


# -----------------------------------------------------------------------------
# Wrapper (weights are already repacked OUTSIDE this function, once).
# -----------------------------------------------------------------------------
@jax.jit
def multi_head_attention(x, w_qkv, w_proj, b_proj):
    """
    x       : (B, T, C)
    w_qkv   : (C, 3*C)  packed [Q | K | V], head h in columns h*HS:(h+1)*HS of each block
    w_proj  : (C, C)
    b_proj  : (1, C)
    returns : (B, T, C)
    """
    B, T, C = x.shape
    H = NUM_HEADS
    HS = C // H
    J = H * T

    x2 = x.reshape(B * T, C)            # fold batch into sublanes (free reshape)

    # Constant masks (depend only on static shapes -> constant-folded by XLA,
    # computed here so the kernel needs no in-kernel integer div/mod).
    j_blk = jnp.arange(J, dtype=jnp.int32) // T
    c_blk = jnp.arange(C, dtype=jnp.int32) // HS
    head_mask = (j_blk[:, None] == c_blk[None, :]).astype(jnp.float32)      # (J, C)

    t_idx = jnp.arange(T, dtype=jnp.int32)
    s_idx = jnp.arange(J, dtype=jnp.int32) % T
    causal_bias = jnp.where(s_idx[None, :] <= t_idx[:, None],
                            0.0, NEG_INF).astype(jnp.float32)               # (T, J)

    kernel = functools.partial(_mha_fused_kernel, batch=B, seq=T, num_heads=H)

    y2 = pl.pallas_call(
        kernel,
        out_shape=jax.ShapeDtypeStruct((B * T, C), x.dtype),
        # Single kernel invocation (no grid): every operand is resident in VMEM
        # for the whole call -- no pipelining, no double-buffered weights.
        in_specs=[pl.BlockSpec(memory_space=pltpu.MemorySpace.VMEM)] * 6,
        out_specs=pl.BlockSpec(memory_space=pltpu.MemorySpace.VMEM),
    )(x2, w_qkv, w_proj, b_proj, head_mask, causal_bias)

    return y2.reshape(B, T, C)


def pack_qkv_weights(wq, wk, wv):
    """Repack per-head (H, C, HS) weights into one (C, 3C) QKV weight.
    Done ONCE at parameter-load time (hoisted out of the jitted forward)."""
    H, C, HS = wq.shape

    def cat_heads(w):                     # (H, C, HS) -> (C, H*HS)
        return jnp.transpose(w, (1, 0, 2)).reshape(C, H * HS)

    return jnp.concatenate([cat_heads(wq), cat_heads(wk), cat_heads(wv)], axis=1)


# -----------------------------------------------------------------------------
# Pure-JAX reference (mirrors the PyTorch forward) for correctness checking
# -----------------------------------------------------------------------------
def reference(x, wk, wq, wv, w_proj, b_proj):
    B, T, C = x.shape
    outs = []
    for h in range(wk.shape[0]):
        k = x @ wk[h]
        q = x @ wq[h]
        v = x @ wv[h]
        wei = (q @ jnp.swapaxes(k, -2, -1)) * (C ** -0.5)
        mask = jnp.tril(jnp.ones((T, T)))
        wei = jnp.where(mask == 0, -jnp.inf, wei)
        wei = jax.nn.softmax(wei, axis=-1)
        outs.append(wei @ v)
    cat = jnp.concatenate(outs, axis=-1)
    return cat @ w_proj + b_proj


if __name__ == "__main__":
    key = jax.random.PRNGKey(0)
    kx, kk, kq, kv, kp, kb = jax.random.split(key, 6)

    B, T, C = 2, BLOCK_SIZE, N_EMBED

    x = jax.random.normal(kx, (B, T, C), dtype=jnp.float32)

    # deterministic synthetic parameters (per-head, like the PyTorch module)
    wk = jax.random.normal(kk, (NUM_HEADS, C, HEAD_SIZE), dtype=jnp.float32) * 0.05
    wq = jax.random.normal(kq, (NUM_HEADS, C, HEAD_SIZE), dtype=jnp.float32) * 0.05
    wv = jax.random.normal(kv, (NUM_HEADS, C, HEAD_SIZE), dtype=jnp.float32) * 0.05
    w_proj = jax.random.normal(kp, (C, C), dtype=jnp.float32) * 0.05
    b_proj = jax.random.normal(kb, (1, C), dtype=jnp.float32) * 0.05

    # Repack once at parameter-load time (not inside the jitted forward).
    w_qkv = pack_qkv_weights(wq, wk, wv)

    out = multi_head_attention(x, w_qkv, w_proj, b_proj)
    out = jax.block_until_ready(out)

    ref = reference(x, wk, wq, wv, w_proj, b_proj)
    assert out.shape == (B, T, C)
    # Exact softmax divide -> tight tolerance.
    assert jnp.allclose(out, ref, atol=1e-4, rtol=1e-4), "mismatch vs reference"

    print("KERNEL_OK")
</pallas_src>

<mosaic_0001>
module attributes {stable_mosaic.version = 11 : i64} {
  func.func @_mha_fused_kernel(%arg0: memref<16x32xf32, #tpu.memory_space<vmem>>, %arg1: memref<32x96xf32, #tpu.memory_space<vmem>>, %arg2: memref<32x32xf32, #tpu.memory_space<vmem>>, %arg3: memref<1x32xf32, #tpu.memory_space<vmem>>, %arg4: memref<32x32xf32, #tpu.memory_space<vmem>>, %arg5: memref<8x32xf32, #tpu.memory_space<vmem>>, %arg6: memref<16x32xf32, #tpu.memory_space<vmem>>) attributes {dimension_semantics = [], scalar_prefetch = 0 : i64, scratch_operands = 0 : i64, tpu.core_type = #tpu.core_type<tc>} {
    %c0 = arith.constant 0 : index
    %c0_0 = arith.constant 0 : index
    %0 = vector.load %arg0[%c0, %c0_0] : memref<16x32xf32, #tpu.memory_space<vmem>>, vector<16x32xf32>
    %c0_1 = arith.constant 0 : index
    %c0_2 = arith.constant 0 : index
    %1 = vector.load %arg1[%c0_1, %c0_2] : memref<32x96xf32, #tpu.memory_space<vmem>>, vector<32x96xf32>
    %cst = arith.constant dense<0.000000e+00> : vector<16x96xf32>
    %2 = tpu.matmul %0, %1, %cst {dimension_numbers = #tpu.dot_dimension_numbers<[1], [0], [0], [1], [0, 0, 1, 1], [], []>} : vector<16x32xf32>, vector<32x96xf32>, vector<16x96xf32> -> vector<16x96xf32>
    %3 = vector.extract_strided_slice %2 {offsets = [0, 0], sizes = [16, 32], strides = [1, 1]} : vector<16x96xf32> to vector<16x32xf32>
    %4 = vector.extract_strided_slice %2 {offsets = [0, 32], sizes = [16, 32], strides = [1, 1]} : vector<16x96xf32> to vector<16x32xf32>
    %5 = vector.extract_strided_slice %2 {offsets = [0, 64], sizes = [16, 32], strides = [1, 1]} : vector<16x96xf32> to vector<16x32xf32>
    %6 = vector.shape_cast %3 : vector<16x32xf32> to vector<2x8x32xf32>
    %7 = vector.shape_cast %4 : vector<16x32xf32> to vector<2x8x32xf32>
    %8 = vector.shape_cast %5 : vector<16x32xf32> to vector<2x8x32xf32>
    %c0_3 = arith.constant 0 : index
    %c0_4 = arith.constant 0 : index
    %9 = vector.load %arg4[%c0_3, %c0_4] : memref<32x32xf32, #tpu.memory_space<vmem>>, vector<32x32xf32>
    %c0_5 = arith.constant 0 : index
    %c0_6 = arith.constant 0 : index
    %10 = vector.load %arg5[%c0_5, %c0_6] : memref<8x32xf32, #tpu.memory_space<vmem>>, vector<8x32xf32>
    %11 = tpu.concatenate %7, %7, %7, %7 in 1 : vector<2x8x32xf32>, vector<2x8x32xf32>, vector<2x8x32xf32>, vector<2x8x32xf32> -> vector<2x32x32xf32>
    %12 = tpu.concatenate %8, %8, %8, %8 in 1 : vector<2x8x32xf32>, vector<2x8x32xf32>, vector<2x8x32xf32>, vector<2x8x32xf32> -> vector<2x32x32xf32>
    %13 = vector.shape_cast %9 : vector<32x32xf32> to vector<1x32x32xf32>
    %14 = vector.broadcast %13 : vector<1x32x32xf32> to vector<2x32x32xf32>
    %15 = arith.mulf %11, %14 : vector<2x32x32xf32>
    %16 = vector.shape_cast %9 : vector<32x32xf32> to vector<1x32x32xf32>
    %17 = vector.broadcast %16 : vector<1x32x32xf32> to vector<2x32x32xf32>
    %18 = arith.mulf %12, %17 : vector<2x32x32xf32>
    "tpu.trace_start"() <{level = 10 : i32, message = "btc,bjc->btj"}> : () -> ()
    %cst_7 = arith.constant dense<0.000000e+00> : vector<2x8x32xf32>
    %19 = tpu.matmul %6, %15, %cst_7 {dimension_numbers = #tpu.dot_dimension_numbers<[2], [2], [1], [1], [0, 0, 0, 1, 1, 1], [0], [0]>} : vector<2x8x32xf32>, vector<2x32x32xf32>, vector<2x8x32xf32> -> vector<2x8x32xf32>
    "tpu.trace_stop"() : () -> ()
    %cst_8 = arith.constant 0.176776692 : f32
    %20 = vector.broadcast %cst_8 : f32 to vector<2x8x32xf32>
    %21 = arith.mulf %19, %20 : vector<2x8x32xf32>
    %22 = vector.shape_cast %10 : vector<8x32xf32> to vector<1x8x32xf32>
    %23 = vector.broadcast %22 : vector<1x8x32xf32> to vector<2x8x32xf32>
    %24 = arith.addf %21, %23 : vector<2x8x32xf32>
    %cst_9 = arith.constant dense<0xFF800000> : vector<2x8xf32>
    %25 = vector.multi_reduction <maximumf>, %24, %cst_9 [2] : vector<2x8x32xf32> to vector<2x8xf32>
    %26 = vector.shape_cast %25 : vector<2x8xf32> to vector<2x8x1xf32>
    %27 = vector.broadcast %26 : vector<2x8x1xf32> to vector<2x8x32xf32>
    %28 = arith.subf %24, %27 : vector<2x8x32xf32>
    %29 = math.exp %28 : vector<2x8x32xf32>
    %30 = vector.shape_cast %29 : vector<2x8x32xf32> to vector<16x32xf32>
    %cst_10 = arith.constant dense<0.000000e+00> : vector<16x32xf32>
    %31 = tpu.matmul %30, %9, %cst_10 {dimension_numbers = #tpu.dot_dimension_numbers<[1], [0], [0], [1], [0, 0, 1, 1], [], []>} : vector<16x32xf32>, vector<32x32xf32>, vector<16x32xf32> -> vector<16x32xf32>
    "tpu.trace_start"() <{level = 10 : i32, message = "btj,bjc->btc"}> : () -> ()
    %cst_11 = arith.constant dense<0.000000e+00> : vector<2x8x32xf32>
    %32 = tpu.matmul %29, %18, %cst_11 {dimension_numbers = #tpu.dot_dimension_numbers<[2], [1], [1], [2], [0, 0, 0, 1, 1, 2], [0], [0]>} : vector<2x8x32xf32>, vector<2x32x32xf32>, vector<2x8x32xf32> -> vector<2x8x32xf32>
    "tpu.trace_stop"() : () -> ()
    %33 = vector.shape_cast %32 : vector<2x8x32xf32> to vector<16x32xf32>
    %34 = arith.divf %33, %31 : vector<16x32xf32>
    %c0_12 = arith.constant 0 : index
    %c0_13 = arith.constant 0 : index
    %35 = vector.load %arg2[%c0_12, %c0_13] : memref<32x32xf32, #tpu.memory_space<vmem>>, vector<32x32xf32>
    %cst_14 = arith.constant dense<0.000000e+00> : vector<16x32xf32>
    %36 = tpu.matmul %34, %35, %cst_14 {dimension_numbers = #tpu.dot_dimension_numbers<[1], [0], [0], [1], [0, 0, 1, 1], [], []>} : vector<16x32xf32>, vector<32x32xf32>, vector<16x32xf32> -> vector<16x32xf32>
    %c0_15 = arith.constant 0 : index
    %c0_16 = arith.constant 0 : index
    %37 = vector.load %arg3[%c0_15, %c0_16] : memref<1x32xf32, #tpu.memory_space<vmem>>, vector<1x32xf32>
    %38 = vector.broadcast %37 : vector<1x32xf32> to vector<16x32xf32>
    %39 = arith.addf %36, %38 : vector<16x32xf32>
    %c0_17 = arith.constant 0 : index
    %c0_18 = arith.constant 0 : index
    %40 = vector.load %arg6[%c0_17, %c0_18] : memref<16x32xf32, #tpu.memory_space<vmem>>, vector<16x32xf32>
    tpu.vector_store %arg6[%c0_17, %c0_18], %39 {strides = array<i32>} : memref<16x32xf32, #tpu.memory_space<vmem>>, vector<16x32xf32>,
    return
  }
}

</mosaic_0001>

<bundles_post_ra>
// kernel: multi_head_attention.1
= control target key start
LH: loop header
LB: loop body
LE: loop exit
PB: predicated region body
PF: predicated region fallthrough
CT: control target
= control target key end

     0   :  { %11 = vsyncpa [#allocation3], 0  ;;  %s1242_s0 = inlined_call_operand.vmem [shape: f32[16,32], index: 0, kind: input, shape index: {}]   ;;  %s1243_s1 = inlined_call_operand.vmem [shape: f32[32,96], index: 1, kind: input, shape index: {}]   ;;  %s1244_s2 = inlined_call_operand.hbm [shape: f32[32,32], index: 2, kind: input, shape index: {}]   ;;  %s1245_s3 = inlined_call_operand.vmem [shape: f32[1,32], index: 3, kind: input, shape index: {}]   ;;  %s1246_s4 = inlined_call_operand.vmem [shape: f32[32,32], index: 4, kind: input, shape index: {}]   ;;  %s1247_s5 = inlined_call_operand.vmem [shape: f32[8,32], index: 5, kind: input, shape index: {}]   ;;  %s1248_s6 = inlined_call_operand.hbm [shape: f32[16,32], index: 6, kind: output, shape index: {}]  }
   0x1   :  { %12 = vsyncpa [#allocation4], 0  ;;  %s1037_s21 = smov [#allocation2]   ;;  %s989_s25 = scalar_lea.hbm %s1244_s2, 512 }
   0x2   :  { %s22_s22 = sshll.u32 %s1037_s21, 4  ;;  %p990_p0 = scmp.ne.s32.totalorder %s1244_s2, %s989_s25  ;;  %s23_s22 = int_to_ptr.vmem [resolvable:$true] %s22_s22 }
   0x3   :  { %p993_p1 = scmp.lt.u32.totalorder %s989_s25, %s1244_s2 }
   0x5   :  { %p995_p2 = pnand %p993_p1, %p990_p0 }
   0x7   :  { %998 = shalt.err (!%p995_p2)
}
   0x8   :  { %s999_s30 = scalar_lea.vmem %s23_s22, 512  ;;  %p1004_p4 = scmp.lt.s32.totalorder %s23_s22, %s23_s22 }
   0x9   :  { %p1000_p3 = scmp.ne.s32.totalorder %s23_s22, %s999_s30  ;;  %p1005_p5 = scmp.lt.s32.totalorder %s999_s30, %s999_s30 }
   0xb   :  { %p1006_p6 = por %p1005_p5, %p1004_p4 }
   0xd   :  { %p1007_p7 = pnand %p1006_p6, %p1000_p3 }
   0xf   :  { %1010 = shalt.err (!%p1007_p7)
}
  0x10   :  { %s1038_s7 = smov 128   ;;  %s1039_s8 = smov 8  }
  0x11   :  { %28 = dma.hbm_to_vmem [thread:$0]  %s1244_s2, 512, %s23_s22, [#allocation3], %s1038_s7, %s1038_s7, %s1039_s8  }
  0x12   :  { %1033 = dma.done.wait [#allocation3], 512  }
  0x13   :  { %1034 = vsyncadd [#allocation3], 4294966784  ;;  %vm44_vm0 = vcmask 261120   ;;  %v40_v0 = vld [vmem:[%s1243_s1] sm:$0xff]  ;;  %v41_v1 = vld [vmem:[%s1243_s1 + $0x8] sm:$0xff]  ;;  %s1040_s24 = smov 32  }
  0x14   :  { %v42_v2 = vld [vmem:[%s1243_s1 + $0x10] sm:$0xff]  ;;  %v879_v3 = vpack.c.bf16 %v41_v1, %v40_v0  ;;  %v43_v4 = vld [vmem:[%s1243_s1 + $0x18] sm:$0xff]  ;;  %v38_v5 = vld [vmem:[%s1242_s0] sm:$0xff]  ;;  %v1041_v14 = vmov 0.0|0.0   ;;  %vm1043_vm1 = vmmov 0   ;;  %v1044_v31 = vmov 0.0  }
  0x15   :  { %v883_v6 = vpack.c.bf16 %v43_v4, %v42_v2  ;;  %810 = vmatprep.mubr.msk.f32.mxu0 %vm44_vm0, %v38_v5  ;;  %v1116_v7 = vld [vmem:[%s1246_s4 + $0x10] sm:$0xff]  ;;  %v1121_v8 = vld [vmem:[%s1246_s4] sm:$0xff]  ;;  %v1128_v9 = vld [vmem:[%s1246_s4 + $0x18] sm:$0xff]  ;;  %887 = vmatprep.subr.bf16.mxu1 %v1041_v14  ;;  %s1046_s11 = smov [#allocation5]  }
  0x16   :  { %880 = vmatprep.subr.bf16.mxu0 %v879_v3  ;;  %139 = vrot.lane.b32.xlu1 %v1116_v7, %s1040_s24  ;;  %v1133_v10 = vld [vmem:[%s1246_s4 + $0x8] sm:$0xff]  ;;  %s1045_s4 = smov 64   ;;  %vm1169_vm2 = vmpackc.low %vm44_vm0, %vm44_vm0  ;;  %v130_v50 = vld [vmem:[%s1247_s5] sm:$0xff]  ;;  %s733_s12 = sshll.u32 %s1046_s11, 4  ;;  %s734_s12 = int_to_ptr.vmem [resolvable:$true] %s733_s12 }
  0x17   :  { %882 = vmatpush3.bf16.msra.mxu0 %v879_v3  ;;  %135 = vrot.lane.b32.xlu0 %v1121_v8, %s1040_s24  ;;  %v39_v11 = vld [vmem:[%s1242_s0 + $0x8] sm:$0xff]  ;;  %s1042_s0 = smov 96   ;;  %s1011_s13 = scalar_lea.vmem %s734_s12, 256 }
  0x18   :  { %884 = vmatprep.subr.bf16.mxu0 %v883_v6  ;;  %821 = vmatprep.mubr.msk.f32.mxu1 %vm1043_vm1, %v1044_v31  ;;  %p1012_p8 = scmp.ne.s32.totalorder %s734_s12, %s1011_s13  ;;  %p1016_p9 = scmp.lt.s32.totalorder %s734_s12, %s734_s12 }
  0x19   :  { %p1017_p10 = scmp.lt.s32.totalorder %s1011_s13, %s1011_s13 }
  0x1a   :  { %141 = vrot.lane.b32.xlu1 %v1128_v9, %s1040_s24 }
  0x1b   :  { %886 = vmatpush3.bf16.msra.mxu0 %v883_v6  ;;  %137 = vrot.lane.b32.xlu0 %v1133_v10, %s1040_s24  ;;  %p1018_p11 = por %p1017_p10, %p1016_p9 }
  0x1c   :  { %895 = vmatprep.subr.bf16.mxu0 %v1041_v14 }
  0x1d   :  { %p1019_p12 = pnand %p1018_p11, %p1012_p8 }
  0x1e   :  { %811 = vmatmul.mubr.msk.f32.vlgmr.msra.gmra.mrb[0].mxu0 %vm44_vm0, %v39_v11 }
  0x1f   :  { %832 = vmatprep.mubr.msk.f32.mxu0 %vm1043_vm1, %v1044_v31 }
  0x88   :  { %v140_v13 = vpop.permute.xlu1 %139 }
  0x89   :  { %v136_v12 = vpop.permute.xlu0 %135 }
  0x8c   :  { %v142_v16 = vpop.permute.xlu1 %141 }
  0x8d   :  { %v138_v15 = vpop.permute.xlu0 %137 }
  0xf1   :  { %v1143_v17 = vpop.f32.mrb[0].mxu0 }
  0xf2   :  { %v1145_v18 = vpop.f32.mrb[1].mxu0  ;;  %v151_v19 = vmul.f32 %v1143_v17, %v136_v12  ;;  %v152_v20 = vmul.f32 %v1143_v17, %v138_v15  ;;  %v153_v24 = vmul.f32 %v1143_v17, %v140_v13  ;;  %v154_v25 = vmul.f32 %v1143_v17, %v142_v16 }
  0xf3   :  { %v147_v21 = vmul.f32 %v136_v12, %v1145_v18  ;;  %v148_v22 = vmul.f32 %v138_v15, %v1145_v18  ;;  %v149_v27 = vmul.f32 %v140_v13, %v1145_v18  ;;  %v150_v28 = vmul.f32 %v142_v16, %v1145_v18 }
  0xf4   :  { %v946_v23 = vpack.i.bf16 %v152_v20, %v151_v19  ;;  %v956_v29 = vpack.i.bf16 %v154_v25, %v153_v24  ;;  %v903_v12 = vpack.c.bf16 %v1133_v10, %v1121_v8 }
  0xf5   :  { %v941_v26 = vpack.i.bf16 %v148_v22, %v147_v21  ;;  %v951_v30 = vpack.i.bf16 %v150_v28, %v149_v27 }
  0xf6   :  { %947 = vrot.lane.b32.xlu1 %v946_v23, %s1042_s0 }
  0xf7   :  { %942 = vrot.lane.b32.xlu0 %v941_v26, %s1042_s0 }
  0xfa   :  { %957 = vrot.lane.b32.xlu1 %v956_v29, %s1042_s0 }
  0xfb   :  { %952 = vrot.lane.b32.xlu0 %v951_v30, %s1042_s0 }
  0xfe   :  { %157 = vrot.lane.b32.xlu1 %v1133_v10, %s1045_s4 }
  0xff   :  { %155 = vrot.lane.b32.xlu0 %v1121_v8, %s1045_s4 }
 0x102   :  { %161 = vrot.lane.b32.xlu1 %v1128_v9, %s1045_s4 }
 0x103   :  { %159 = vrot.lane.b32.xlu0 %v1116_v7, %s1045_s4 }
 0x168   :  { %v948_v32 = vpop.permute.xlu1 %947 }
 0x169   :  { %v950_v33 = vunpack.i.h.bf16 %v948_v32  ;;  %v949_v34 = vunpack.i.l.bf16 %v948_v32  ;;  %v943_v35 = vpop.permute.xlu0 %942 }
 0x16a   :  { %v945_v36 = vunpack.i.h.bf16 %v943_v35  ;;  %v944_v37 = vunpack.i.l.bf16 %v943_v35 }
 0x16b   :  { %v896_v39 = vpack.c.bf16 %v950_v33, %v949_v34 }
 0x16c   :  { %v888_v40 = vpack.c.bf16 %v945_v36, %v944_v37  ;;  %v958_v41 = vpop.permute.xlu1 %957 }
 0x16d   :  { %898 = vmatpush3.bf16.xpose.msk.msra.mxu0 %vm1169_vm2, %v896_v39  ;;  %v953_v42 = vpop.permute.xlu0 %952  ;;  %v960_v43 = vunpack.i.h.bf16 %v958_v41  ;;  %v959_v44 = vunpack.i.l.bf16 %v958_v41  ;;  %v635_v41 = vld [vmem:[#allocation2 + $0x8] sm:$0xff] }
 0x16e   :  { %890 = vmatpush3.bf16.xpose.msk.msra.mxu1 %vm1169_vm2, %v888_v40  ;;  %899 = vmatprep.subr.bf16.mxu0 %v1041_v14  ;;  %v955_v45 = vunpack.i.h.bf16 %v953_v42  ;;  %v954_v46 = vunpack.i.l.bf16 %v953_v42  ;;  %v634_v40 = vld [vmem:[#allocation2] sm:$0xff] }
 0x16f   :  { %891 = vmatprep.subr.bf16.mxu1 %v1041_v14  ;;  %v900_v47 = vpack.c.bf16 %v960_v43, %v959_v44  ;;  %v923_v42 = vpack.c.bf16 %v635_v41, %v634_v40  ;;  %v636_v43 = vld [vmem:[#allocation2 + $0x10] sm:$0xff]  ;;  %v637_v44 = vld [vmem:[#allocation2 + $0x18] sm:$0xff] }
 0x170   :  { %v892_v48 = vpack.c.bf16 %v955_v45, %v954_v46  ;;  %v158_v60 = vpop.permute.xlu1 %157  ;;  %v927_v45 = vpack.c.bf16 %v637_v44, %v636_v43 }
 0x171   :  { %v156_v61 = vpop.permute.xlu0 %155  ;;  %v172_v62 = vmul.f32 %v1143_v17, %v158_v60  ;;  %v168_v5 = vmul.f32 %v158_v60, %v1145_v18 }
 0x172   :  { %v171_v63 = vmul.f32 %v1143_v17, %v156_v61  ;;  %v167_v6 = vmul.f32 %v156_v61, %v1145_v18 }
 0x174   :  { %v162_v0 = vpop.permute.xlu1 %161  ;;  %v966_v2 = vpack.i.bf16 %v172_v62, %v171_v63  ;;  %v961_v13 = vpack.i.bf16 %v168_v5, %v167_v6 }
 0x175   :  { %902 = vmatpush3.bf16.xpose.msk.msra.mxu0 %vm1169_vm2, %v900_v47  ;;  %v160_v1 = vpop.permute.xlu0 %159  ;;  %v174_v3 = vmul.f32 %v1143_v17, %v162_v0  ;;  %v170_v15 = vmul.f32 %v162_v0, %v1145_v18 }
 0x176   :  { %894 = vmatpush3.bf16.xpose.msk.msra.mxu1 %vm1169_vm2, %v892_v48  ;;  %911 = vmatprep.subr.bf16.mxu0 %v1041_v14  ;;  %v173_v4 = vmul.f32 %v1143_v17, %v160_v1  ;;  %v169_v16 = vmul.f32 %v160_v1, %v1145_v18 }
 0x177   :  { %904 = vmatprep.subr.bf16.mxu1 %v903_v12 }
 0x178   :  { %v976_v11 = vpack.i.bf16 %v174_v3, %v173_v4  ;;  %v971_v19 = vpack.i.bf16 %v170_v15, %v169_v16 }
 0x17c   :  { %833 = vmatmul.mubr.msk.f32.vlgmr.msra.gmra.mrb[2].mxu0 %vm44_vm0, %v1143_v17  ;;  %v907_v17 = vpack.c.bf16 %v1128_v9, %v1116_v7 }
 0x17d   :  { %822 = vmatmul.mubr.msk.f32.vlgmr.msra.gmra.mrb[0].mxu1 %vm44_vm0, %v1145_v18  ;;  %854 = vmatprep.mubr.msk.f32.mxu0 %vm1043_vm1, %v1044_v31 }
 0x17e   :  { %906 = vmatpush3.bf16.msra.mxu1 %v903_v12 }
 0x17f   :  { %908 = vmatprep.subr.bf16.mxu1 %v907_v17 }
 0x182   :  { %910 = vmatpush3.bf16.msra.mxu1 %v907_v17 }
 0x183   :  { %917 = vmatprep.subr.bf16.mxu1 %v1041_v14 }
 0x24f   :  { %v357_v49 = vpop.f32.mrb[2].mxu0 }
 0x250   :  { %v362_v51 = vmul.f32 0.17677669, %v357_v49  ;;  %v264_v52 = vpop.f32.mrb[0].mxu1  ;;  %v834_v53 = vpop.f32.mrb[3].mxu0 }
 0x251   :  { %v361_v54 = vmul.f32 0.17677669, %v264_v52  ;;  %v823_v55 = vpop.f32.mrb[1].mxu1 }
 0x252   :  { %v364_v56 = vadd.f32 %v362_v51, %v130_v50 }
 0x253   :  { %v363_v57 = vadd.f32 %v361_v54, %v130_v50  ;;  %v761_v54 = vld [vmem:[%s1245_s3] ss:$0 sm:$0xff] }
 0x254   :  { %v368_v58 = vsel %vm44_vm0, %v364_v56, -inf }
 0x255   :  { %369 = vmax.xlane.f32.xlu1 %v368_v58  ;;  %v365_v59 = vsel %vm44_vm0, %v363_v57, -inf }
 0x256   :  { %366 = vmax.xlane.f32.xlu0 %v365_v59 }
 0x266   :  { %967 = vrot.lane.b32.xlu1 %v966_v2, %s1045_s4 }
 0x26a   :  { %977 = vrot.lane.b32.xlu1 %v976_v11, %s1045_s4 }
 0x26c   :  { %962 = vrot.lane.b32.xlu0 %v961_v13, %s1045_s4 }
 0x270   :  { %972 = vrot.lane.b32.xlu0 %v971_v19, %s1045_s4 }
 0x2e2   :  { %v370_v8 = vpop.xlane.xlu1 %369 }
 0x2e3   :  { %v372_v10 = vsub.f32 %v364_v56, %v370_v8  ;;  %v367_v20 = vpop.xlane.xlu0 %366 }
 0x2e4   :  { %v371_v18 = vsub.f32 %v363_v57, %v367_v20 }
 0x2e5   :  { %v375_v21 = vmul.f32 1.442695, %v372_v10 }
 0x2e6   :  { %v373_v22 = vmul.f32 1.442695, %v371_v18  ;;  %v968_v26 = vpop.permute.xlu1 %967 }
 0x2e7   :  { %v963_v23 = vpop.permute.xlu0 %962  ;;  %v970_v30 = vunpack.i.h.bf16 %v968_v26  ;;  %v969_v32 = vunpack.i.l.bf16 %v968_v26 }
 0x2e8   :  { %981 = vpow2.f32 %v373_v22  ;;  %v965_v24 = vunpack.i.h.bf16 %v963_v23  ;;  %v964_v25 = vunpack.i.l.bf16 %v963_v23 }
 0x2e9   :  { %983 = vpow2.f32 %v375_v21  ;;  %v918_v36 = vpack.c.bf16 %v970_v30, %v969_v32 }
 0x2ea   :  { %v912_v7 = vpack.c.bf16 %v965_v24, %v964_v25  ;;  %v978_v33 = vpop.permute.xlu1 %977 }
 0x2eb   :  { %v973_v9 = vpop.permute.xlu0 %972  ;;  %v980_v37 = vunpack.i.h.bf16 %v978_v33  ;;  %v979_v38 = vunpack.i.l.bf16 %v978_v33 }
 0x2ec   :  { %v975_v27 = vunpack.i.h.bf16 %v973_v9  ;;  %v974_v28 = vunpack.i.l.bf16 %v973_v9  ;;  %913 = vmatpush3.bf16.msra.mxu0 %v912_v7 }
 0x2ed   :  { %914 = vmatprep.subr.bf16.mxu0 %v1041_v14  ;;  %v921_v39 = vpack.c.bf16 %v980_v37, %v979_v38 }
 0x2ee   :  { %v915_v29 = vpack.c.bf16 %v975_v27, %v974_v28 }
 0x2f0   :  { %916 = vmatpush3.bf16.msra.mxu0 %v915_v29 }
 0x2f1   :  { %924 = vmatprep.subr.bf16.mxu0 %v923_v42 }
 0x2f2   :  { %v982_v34 = vpop.eup %981 }
 0x2f3   :  { %v984_v35 = vpop.eup %983  ;;  %843 = vmatprep.mubr.msk.f32.mxu1 %vm44_vm0, %v982_v34  ;;  %855 = vmatmul.mubr.msk.f32.vlgmr.msra.gmra.mrb[4].mxu0 %vm44_vm0, %v982_v34 }
 0x2f4   :  { %844 = vmatmul.mubr.msk.f32.vlgmr.msra.gmra.mrb[2].mxu1 %vm44_vm0, %v984_v35  ;;  %926 = vmatpush3.bf16.msra.mxu0 %v923_v42 }
 0x2f5   :  { %919 = vmatpush3.bf16.msra.mxu1 %v918_v36  ;;  %865 = vmatprep.mubr.msk.f32.mxu1 %vm1043_vm1, %v1044_v31 }
 0x2f6   :  { %920 = vmatprep.subr.bf16.mxu1 %v1041_v14  ;;  %928 = vmatprep.subr.bf16.mxu0 %v927_v45 }
 0x2f8   :  { %930 = vmatpush3.bf16.msra.mxu0 %v927_v45 }
 0x2f9   :  { %922 = vmatpush3.bf16.msra.mxu1 %v921_v39 }
 0x2fc   :  { %866 = vmatmul.mubr.msk.f32.vlgmr.msra.gmra.mrb[4].mxu1 %vm44_vm0, %v984_v35 }
 0x3c6   :  { %v540_v46 = vpop.f32.mrb[4].mxu0 }
 0x3c7   :  { %v845_v47 = vpop.f32.mrb[2].mxu1  ;;  %v856_v48 = vpop.f32.mrb[5].mxu0 }
 0x3c8   :  { %985 = vrcp.f32 %v845_v47  ;;  %v449_v31 = vpop.f32.mrb[3].mxu1 }
 0x3c9   :  { %987 = vrcp.f32 %v449_v31 }
 0x3cf   :  { %v626_v14 = vpop.f32.mrb[4].mxu1 }
 0x3d0   :  { %v867_v49 = vpop.f32.mrb[5].mxu1 }
 0x3d2   :  { %v986_v50 = vpop.eup %985 }
 0x3d3   :  { %v988_v51 = vpop.eup %987  ;;  %v633_v52 = vmul.f32 %v986_v50, %v626_v14 }
 0x3d4   :  { %v631_v53 = vmul.f32 %v988_v51, %v540_v46 }
 0x3d6   :  { %876 = vmatprep.mubr.msk.f32.mxu0 %vm44_vm0, %v631_v53 }
 0x3d7   :  { %877 = vmatmul.mubr.msk.f32.vlgmr.msra.gmra.mrb[6].mxu0 %vm44_vm0, %v633_v52 }
 0x4aa   :  { %v878_v55 = vpop.f32.mrb[6].mxu0 }
 0x4ab   :  { %v723_v56 = vadd.f32 %v878_v55, %v761_v54  ;;  %v717_v57 = vpop.f32.mrb[7].mxu0 }
 0x4ac   :  { %v718_v58 = vadd.f32 %v761_v54, %v717_v57 }
 0x4ad   :  { %727 = vst.msk [vmem:[#allocation5 + $0x8] sm:$0xff] %vm44_vm0, %v723_v56 }
 0x4ae   :  { %726 = vst.msk [vmem:[#allocation5] sm:$0xff] %vm44_vm0, %v718_v58 }
 0x4af   :  { %1022 = shalt.err (!%p1019_p12)
}
 0x4b0   :  { %s1023_s15 = scalar_lea.hbm %s1248_s6, 256 }
 0x4b1   :  { %p1024_p13 = scmp.ne.s32.totalorder %s1248_s6, %s1023_s15  ;;  %p1027_p0 = scmp.lt.u32.totalorder %s1023_s15, %s1248_s6 }
 0x4b3   :  { %p1029_p1 = pnand %p1027_p0, %p1024_p13 }
 0x4b5   :  { %1032 = shalt.err (!%p1029_p1)
}
 0x4b6   :  { %739 = dma.vmem_to_hbm [thread:$0]  %s734_s12, 256, %s1248_s6, [#allocation4], %s1038_s7, %s1038_s7, %s1039_s8  }
 0x4b7   :  { %1035 = dma.done.wait [#allocation4], 256  }
 0x4b8   :  { %1036 = vsyncadd [#allocation4], 4294967040 }
 0x4b9   :  { %743 = vsyncpa [#allocation3], 1 }
 0x4ba   :  { %744 = vsyncpa [#allocation4], 1 }

</bundles_post_ra>
